<compile_context>
chip_gen: v6e
topology: v6e:2x2x1
jax: 0.10.0
libtpu: 0.0.40
codegen_flags: <defaults>
</compile_context>

<pallas_src>
import jax
import jax.numpy as jnp
import numpy as np
from jax import lax
from jax.experimental import pallas as pl
from jax.experimental.pallas import tpu as pltpu


_ACTS = {
    "relu": lambda x: jnp.maximum(x, 0.0),
    "tanh": jnp.tanh,
    "sigmoid": jax.nn.sigmoid,
}


def _round_up(x, m):
    return ((x + m - 1) // m) * m


# ----------------------------------------------------------------------------
# MLP path: feat = act(...act(act(x @ W0.T + b0) @ W1.T + b1)...)
# ----------------------------------------------------------------------------
def _make_mlp_kernel(num_layers, activation):
    act = _ACTS[activation]

    def kernel(x_ref, *refs):
        # refs = (w0, b0, w1, b1, ..., out_ref); weights already (in, out).
        out_ref = refs[-1]
        h = x_ref[...].astype(jnp.float32)
        for l in range(num_layers):
            w = refs[2 * l][...]          # (in_l, out_l)
            b = refs[2 * l + 1][...]      # (1, out_l)
            h = act(jnp.dot(h, w, preferred_element_type=jnp.float32) + b)
        out_ref[...] = h.astype(out_ref.dtype)

    return kernel


def mlp_forward(x2d, weights_t, biases_r, activation, max_tile_rows=512):
    """x2d: (n, dim_t); weights_t[l]: (in_l, out_l); biases_r[l]: (1, out_l)."""
    n, dim_t = x2d.shape
    num_units = weights_t[-1].shape[1]
    num_layers = len(weights_t)

    # Row tiling: scales with n, pipelines HBM loads against MXU work, and is
    # sized well below the v7x 32 MiB scoped-VMEM default even for wide layers.
    tile = min(max_tile_rows, _round_up(n, 8))
    npad = _round_up(n, tile)
    if npad != n:
        x2d = jnp.pad(x2d, ((0, npad - n), (0, 0)))

    in_specs = [pl.BlockSpec((tile, dim_t), lambda i: (i, 0))]
    args = [x2d]
    for w, b in zip(weights_t, biases_r):
        in_specs.append(pl.BlockSpec(w.shape, lambda i: (0, 0)))  # resident weights
        in_specs.append(pl.BlockSpec(b.shape, lambda i: (0, 0)))
        args.append(w)
        args.append(b)

    out = pl.pallas_call(
        _make_mlp_kernel(num_layers, activation),
        out_shape=jax.ShapeDtypeStruct((npad, num_units), jnp.float32),
        grid=(npad // tile,),
        in_specs=in_specs,
        out_specs=pl.BlockSpec((tile, num_units), lambda i: (i, 0)),
        compiler_params=pltpu.CompilerParams(dimension_semantics=("parallel",)),
    )(*args)
    return out[:n]


def mlp_reference(x2d, weights, biases, activation):
    act = _ACTS[activation]
    h = x2d
    for w, b in zip(weights, biases):
        h = act(h @ w.T + b)
    return h


# ----------------------------------------------------------------------------
# GRU path: nn.GRU(1, num_units_feat, num_layers=num_rnns_feat), h_0 = 0,
#           feat = out[-1].  One fused pallas_call for all layers.
# ----------------------------------------------------------------------------
def _make_gru_fused_kernel(num_layers, T, n, H):
    def kernel(*refs):
        xs_ref = refs[0]                              # (T*n, 1) time-major flat input
        param_refs = refs[1:1 + 4 * num_layers]       # per layer: wih, whh, bih, bhh
        out_ref = refs[1 + 4 * num_layers]            # (n, H)
        gi_scr = refs[1 + 4 * num_layers + 1]         # VMEM (T*n, Gp) input gates
        seq_scr = refs[1 + 4 * num_layers + 2]        # VMEM (T*n, H) inter-layer seq

        unroll = T <= 32
        h_final = None

        for l in range(num_layers):
            wih = param_refs[4 * l][...]              # (in_l, Gp), gates [r|z|n] pad->Gp
            whh = param_refs[4 * l + 1][...]          # (H, Gp)
            bih = param_refs[4 * l + 2][...]          # (1, Gp)
            bhh = param_refs[4 * l + 3][...]          # (1, Gp)

            # --- input-gate contributions for ALL time steps in one shot ---
            if l == 0:
                xs = xs_ref[...].astype(jnp.float32)  # (T*n, 1); in_dim==1 -> broadcast
                gi_scr[...] = xs * wih + bih
            else:
                seq_prev = seq_scr[...]               # (T*n, H) from previous layer
                gi_scr[...] = (
                    jnp.dot(seq_prev, wih, preferred_element_type=jnp.float32) + bih
                )

            is_last = l == num_layers - 1

            def step(t, h, whh=whh, bhh=bhh, is_last=is_last):
                start = pl.multiple_of(t * n, n)
                gi = gi_scr[pl.ds(start, n), :]       # (n, Gp)
                # single fused hidden-gate matmul on the serial critical path
                gh = jnp.dot(h, whh, preferred_element_type=jnp.float32) + bhh
                r = jax.nn.sigmoid(gi[:, :H] + gh[:, :H])
                z = jax.nn.sigmoid(gi[:, H:2 * H] + gh[:, H:2 * H])
                nc = jnp.tanh(gi[:, 2 * H:3 * H] + r * gh[:, 2 * H:3 * H])
                h_new = (1.0 - z) * nc + z * h
                if not is_last:
                    # keep inter-layer sequence in VMEM; never touches HBM
                    seq_scr[pl.ds(start, n), :] = h_new
                return h_new

            h_final = lax.fori_loop(0, T, step, jnp.zeros((n, H), jnp.float32),
                                    unroll=unroll)

        # only the final hidden state of the last layer is consumed (out[-1])
        out_ref[...] = h_final.astype(out_ref.dtype)

    return kernel


def gru_forward(x2d, fused_params, hidden):
    """x2d: (n, dim_t) -> (n, hidden). fused_params: per-layer (wih, whh, bih, bhh)."""
    n, T = x2d.shape
    H = hidden
    Gp = fused_params[0][0].shape[1]
    num_layers = len(fused_params)

    # PyTorch: x_.T.unsqueeze(2) -> (T, n, 1); flatten time-major to (T*n, 1).
    xs = x2d.T.reshape(T * n, 1).astype(jnp.float32)
    args = [xs]
    for p in fused_params:
        args.extend(p)

    return pl.pallas_call(
        _make_gru_fused_kernel(num_layers, T, n, H),
        out_shape=jax.ShapeDtypeStruct((n, H), jnp.float32),
        scratch_shapes=[
            pltpu.VMEM((T * n, Gp), jnp.float32),   # input-gate precompute
            pltpu.VMEM((T * n, H), jnp.float32),    # inter-layer sequence
        ],
    )(*args)


def gru_reference(x2d, raw_layers, hidden):
    H = hidden
    seq = x2d.T[:, :, None]
    for (w_ih, w_hh, b_ih, b_hh) in raw_layers:
        h = jnp.zeros((x2d.shape[0], H), jnp.float32)
        outs = []
        for t in range(seq.shape[0]):
            gi = seq[t] @ w_ih.T + b_ih
            gh = h @ w_hh.T + b_hh
            r = jax.nn.sigmoid(gi[:, :H] + gh[:, :H])
            z = jax.nn.sigmoid(gi[:, H:2 * H] + gh[:, H:2 * H])
            nc = jnp.tanh(gi[:, 2 * H:] + r * gh[:, 2 * H:])
            h = (1.0 - z) * nc + z * h
            outs.append(h)
        seq = jnp.stack(outs)
    return seq[-1]


# ----------------------------------------------------------------------------
# Parameter init (PyTorch-default uniform(-1/sqrt(fan), 1/sqrt(fan)))
# ----------------------------------------------------------------------------
def init_mlp_params(key, sizes):
    weights, biases = [], []
    for i in range(len(sizes) - 1):
        fan_in, fan_out = sizes[i], sizes[i + 1]
        bound = 1.0 / np.sqrt(fan_in)
        key, k1, k2 = jax.random.split(key, 3)
        weights.append(jax.random.uniform(k1, (fan_out, fan_in), jnp.float32, -bound, bound))
        biases.append(jax.random.uniform(k2, (fan_out,), jnp.float32, -bound, bound))
    return weights, biases


def init_gru_params(key, input_size, hidden, num_layers):
    raw = []
    for l in range(num_layers):
        in_dim = input_size if l == 0 else hidden
        bound = 1.0 / np.sqrt(hidden)
        key, k1, k2, k3, k4 = jax.random.split(key, 5)
        w_ih = jax.random.uniform(k1, (3 * hidden, in_dim), jnp.float32, -bound, bound)
        w_hh = jax.random.uniform(k2, (3 * hidden, hidden), jnp.float32, -bound, bound)
        b_ih = jax.random.uniform(k3, (3 * hidden,), jnp.float32, -bound, bound)
        b_hh = jax.random.uniform(k4, (3 * hidden,), jnp.float32, -bound, bound)
        raw.append((w_ih, w_hh, b_ih, b_hh))
    return raw


def gru_raw_to_fused_params(raw_layers, hidden):
    """Concatenate gate weights [r|z|n] to (in, 3H), pad lanes 3H -> mult of 128."""
    H = hidden
    G = 3 * H
    Gp = _round_up(G, 128)
    fused = []
    for (w_ih, w_hh, b_ih, b_hh) in raw_layers:
        wih = jnp.zeros((w_ih.shape[1], Gp), jnp.float32).at[:, :G].set(jnp.asarray(w_ih).T)
        whh = jnp.zeros((H, Gp), jnp.float32).at[:, :G].set(jnp.asarray(w_hh).T)
        bih = jnp.zeros((1, Gp), jnp.float32).at[:, :G].set(jnp.asarray(b_ih)[None, :])
        bhh = jnp.zeros((1, Gp), jnp.float32).at[:, :G].set(jnp.asarray(b_hh)[None, :])
        fused.append((wih, whh, bih, bhh))
    return fused


# ----------------------------------------------------------------------------
# FeatureExtractor wrapper
# ----------------------------------------------------------------------------
class FeatureExtractor:
    def __init__(self, config, key):
        self.dim_t = config["dim_t"]
        self.activation = config["activation"]
        self.arch_feat = config["arch_feat"]
        self.num_units_feat = config["num_units_feat"]
        if self.arch_feat == "mlp":
            sizes = [self.dim_t] + config["hidlayers_feat"] + [self.num_units_feat]
            self.weights, self.biases = init_mlp_params(key, sizes)
            # kernel-ready layouts built once (no per-call transposes/reshapes)
            self.weights_t = [jnp.asarray(w).T for w in self.weights]
            self.biases_r = [jnp.asarray(b).reshape(1, -1) for b in self.biases]
        elif self.arch_feat == "rnn":
            self.num_rnns_feat = config["num_rnns_feat"]
            self.raw_gru = init_gru_params(key, 1, self.num_units_feat, self.num_rnns_feat)
            self.fused_gru = gru_raw_to_fused_params(self.raw_gru, self.num_units_feat)
        else:
            raise ValueError("unknown feature type")

    def __call__(self, x):
        x2d = x.reshape(-1, self.dim_t)                # x.view(-1, dim_t)
        if self.arch_feat == "mlp":
            return mlp_forward(x2d, self.weights_t, self.biases_r, self.activation)
        else:
            return gru_forward(x2d, self.fused_gru, self.num_units_feat)

    def reference(self, x):
        x2d = x.reshape(-1, self.dim_t)
        if self.arch_feat == "mlp":
            return mlp_reference(x2d, self.weights, self.biases, self.activation)
        else:
            return gru_reference(x2d, self.raw_gru, self.num_units_feat)


if __name__ == "__main__":
    key = jax.random.PRNGKey(0)
    kx, kmlp, krnn = jax.random.split(key, 3)

    # x: (2, 4, 16) -> x.view(-1, dim_t) gives n = 8 rows of dim_t = 16
    x = jax.random.normal(kx, (2, 4, 16), jnp.float32)

    # --- MLP arch ---
    cfg_mlp = dict(dim_t=16, activation="tanh", arch_feat="mlp",
                   num_units_feat=32, hidlayers_feat=[32, 32])
    fe_mlp = FeatureExtractor(cfg_mlp, kmlp)
    feat_mlp = jax.block_until_ready(fe_mlp(x))
    ref_mlp = fe_mlp.reference(x)
    assert feat_mlp.shape == (8, 32)
    np.testing.assert_allclose(np.asarray(feat_mlp), np.asarray(ref_mlp),
                               rtol=1e-4, atol=1e-4)

    # --- RNN (GRU) arch ---
    cfg_rnn = dict(dim_t=16, activation="tanh", arch_feat="rnn",
                   num_units_feat=32, num_rnns_feat=2)
    fe_rnn = FeatureExtractor(cfg_rnn, krnn)
    feat_rnn = jax.block_until_ready(fe_rnn(x))
    ref_rnn = fe_rnn.reference(x)
    assert feat_rnn.shape == (8, 32)
    np.testing.assert_allclose(np.asarray(feat_rnn), np.asarray(ref_rnn),
                               rtol=1e-4, atol=1e-4)

    print("KERNEL_OK")
</pallas_src>

<mosaic_0001>
module attributes {stable_mosaic.version = 11 : i64} {
  func.func @kernel(%arg0: i32, %arg1: memref<8x16xf32, #tpu.memory_space<vmem>>, %arg2: memref<16x32xf32, #tpu.memory_space<vmem>>, %arg3: memref<1x32xf32, #tpu.memory_space<vmem>>, %arg4: memref<32x32xf32, #tpu.memory_space<vmem>>, %arg5: memref<1x32xf32, #tpu.memory_space<vmem>>, %arg6: memref<32x32xf32, #tpu.memory_space<vmem>>, %arg7: memref<1x32xf32, #tpu.memory_space<vmem>>, %arg8: memref<8x32xf32, #tpu.memory_space<vmem>>) attributes {dimension_semantics = [#tpu.dimension_semantics<parallel>], iteration_bounds = array<i64: 1>, scalar_prefetch = 0 : i64, scratch_operands = 0 : i64, tpu.core_type = #tpu.core_type<tc>, window_params = [{transform_indices = @transform_0, window_bounds = array<i64: 8, 16>}, {pipeline_mode = #tpu.pipeline_mode<synchronous>, transform_indices = @transform_1, window_bounds = array<i64: 16, 32>}, {pipeline_mode = #tpu.pipeline_mode<synchronous>, transform_indices = @transform_2, window_bounds = array<i64: 1, 32>}, {pipeline_mode = #tpu.pipeline_mode<synchronous>, transform_indices = @transform_3, window_bounds = array<i64: 32, 32>}, {pipeline_mode = #tpu.pipeline_mode<synchronous>, transform_indices = @transform_4, window_bounds = array<i64: 1, 32>}, {pipeline_mode = #tpu.pipeline_mode<synchronous>, transform_indices = @transform_5, window_bounds = array<i64: 32, 32>}, {pipeline_mode = #tpu.pipeline_mode<synchronous>, transform_indices = @transform_6, window_bounds = array<i64: 1, 32>}, {transform_indices = @transform_7, window_bounds = array<i64: 8, 32>}]} {
    %c0 = arith.constant 0 : index
    %c0_0 = arith.constant 0 : index
    %0 = vector.load %arg1[%c0, %c0_0] : memref<8x16xf32, #tpu.memory_space<vmem>>, vector<8x16xf32>
    %c0_1 = arith.constant 0 : index
    %c0_2 = arith.constant 0 : index
    %1 = vector.load %arg2[%c0_1, %c0_2] : memref<16x32xf32, #tpu.memory_space<vmem>>, vector<16x32xf32>
    %c0_3 = arith.constant 0 : index
    %c0_4 = arith.constant 0 : index
    %2 = vector.load %arg3[%c0_3, %c0_4] : memref<1x32xf32, #tpu.memory_space<vmem>>, vector<1x32xf32>
    %cst = arith.constant dense<0.000000e+00> : vector<8x32xf32>
    %3 = tpu.matmul %0, %1, %cst {dimension_numbers = #tpu.dot_dimension_numbers<[1], [0], [0], [1], [0, 0, 1, 1], [], []>} : vector<8x16xf32>, vector<16x32xf32>, vector<8x32xf32> -> vector<8x32xf32>
    %4 = vector.broadcast %2 : vector<1x32xf32> to vector<8x32xf32>
    %5 = arith.addf %3, %4 : vector<8x32xf32>
    %6 = math.tanh %5 : vector<8x32xf32>
    %c0_5 = arith.constant 0 : index
    %c0_6 = arith.constant 0 : index
    %7 = vector.load %arg4[%c0_5, %c0_6] : memref<32x32xf32, #tpu.memory_space<vmem>>, vector<32x32xf32>
    %c0_7 = arith.constant 0 : index
    %c0_8 = arith.constant 0 : index
    %8 = vector.load %arg5[%c0_7, %c0_8] : memref<1x32xf32, #tpu.memory_space<vmem>>, vector<1x32xf32>
    %cst_9 = arith.constant dense<0.000000e+00> : vector<8x32xf32>
    %9 = tpu.matmul %6, %7, %cst_9 {dimension_numbers = #tpu.dot_dimension_numbers<[1], [0], [0], [1], [0, 0, 1, 1], [], []>} : vector<8x32xf32>, vector<32x32xf32>, vector<8x32xf32> -> vector<8x32xf32>
    %10 = vector.broadcast %8 : vector<1x32xf32> to vector<8x32xf32>
    %11 = arith.addf %9, %10 : vector<8x32xf32>
    %12 = math.tanh %11 : vector<8x32xf32>
    %c0_10 = arith.constant 0 : index
    %c0_11 = arith.constant 0 : index
    %13 = vector.load %arg6[%c0_10, %c0_11] : memref<32x32xf32, #tpu.memory_space<vmem>>, vector<32x32xf32>
    %c0_12 = arith.constant 0 : index
    %c0_13 = arith.constant 0 : index
    %14 = vector.load %arg7[%c0_12, %c0_13] : memref<1x32xf32, #tpu.memory_space<vmem>>, vector<1x32xf32>
    %cst_14 = arith.constant dense<0.000000e+00> : vector<8x32xf32>
    %15 = tpu.matmul %12, %13, %cst_14 {dimension_numbers = #tpu.dot_dimension_numbers<[1], [0], [0], [1], [0, 0, 1, 1], [], []>} : vector<8x32xf32>, vector<32x32xf32>, vector<8x32xf32> -> vector<8x32xf32>
    %16 = vector.broadcast %14 : vector<1x32xf32> to vector<8x32xf32>
    %17 = arith.addf %15, %16 : vector<8x32xf32>
    %18 = math.tanh %17 : vector<8x32xf32>
    %c0_15 = arith.constant 0 : index
    %c0_16 = arith.constant 0 : index
    %19 = vector.load %arg8[%c0_15, %c0_16] : memref<8x32xf32, #tpu.memory_space<vmem>>, vector<8x32xf32>
    tpu.vector_store %arg8[%c0_15, %c0_16], %18 {strides = array<i32>} : memref<8x32xf32, #tpu.memory_space<vmem>>, vector<8x32xf32>,
    return
  }
  func.func @transform_0(%arg0: i32) -> (i32, i32) {
    %c0_i32 = arith.constant 0 : i32
    %c0_i32_0 = arith.constant 0 : i32
    return %arg0, %c0_i32 : i32, i32
  }
  func.func @transform_1(%arg0: i32) -> (i32, i32) {
    %c0_i32 = arith.constant 0 : i32
    %c0_i32_0 = arith.constant 0 : i32
    %c0_i32_1 = arith.constant 0 : i32
    return %c0_i32, %c0_i32_0 : i32, i32
  }
  func.func @transform_2(%arg0: i32) -> (i32, i32) {
    %c0_i32 = arith.constant 0 : i32
    %c0_i32_0 = arith.constant 0 : i32
    %c0_i32_1 = arith.constant 0 : i32
    return %c0_i32, %c0_i32_0 : i32, i32
  }
  func.func @transform_3(%arg0: i32) -> (i32, i32) {
    %c0_i32 = arith.constant 0 : i32
    %c0_i32_0 = arith.constant 0 : i32
    %c0_i32_1 = arith.constant 0 : i32
    return %c0_i32, %c0_i32_0 : i32, i32
  }
  func.func @transform_4(%arg0: i32) -> (i32, i32) {
    %c0_i32 = arith.constant 0 : i32
    %c0_i32_0 = arith.constant 0 : i32
    %c0_i32_1 = arith.constant 0 : i32
    return %c0_i32, %c0_i32_0 : i32, i32
  }
  func.func @transform_5(%arg0: i32) -> (i32, i32) {
    %c0_i32 = arith.constant 0 : i32
    %c0_i32_0 = arith.constant 0 : i32
    %c0_i32_1 = arith.constant 0 : i32
    return %c0_i32, %c0_i32_0 : i32, i32
  }
  func.func @transform_6(%arg0: i32) -> (i32, i32) {
    %c0_i32 = arith.constant 0 : i32
    %c0_i32_0 = arith.constant 0 : i32
    %c0_i32_1 = arith.constant 0 : i32
    return %c0_i32, %c0_i32_0 : i32, i32
  }
  func.func @transform_7(%arg0: i32) -> (i32, i32) {
    %c0_i32 = arith.constant 0 : i32
    %c0_i32_0 = arith.constant 0 : i32
    return %arg0, %c0_i32 : i32, i32
  }
}

</mosaic_0001>

<bundles_post_ra>
// kernel: tpu_custom_call.1
= control target key start
LH: loop header
LB: loop body
LE: loop exit
PB: predicated region body
PF: predicated region fallthrough
CT: control target
= control target key end

     0   :  { %12 = vsyncpa [#allocation3], 0  ;;  %s610_s0 = inlined_call_operand.hbm [shape: f32[8,16], index: 0, kind: input, shape index: {}]   ;;  %s611_s1 = inlined_call_operand.hbm [shape: f32[16,32], index: 1, kind: input, shape index: {}]   ;;  %s612_s2 = inlined_call_operand.vmem [shape: f32[1,32], index: 2, kind: input, shape index: {}]   ;;  %s613_s3 = inlined_call_operand.hbm [shape: f32[32,32], index: 3, kind: input, shape index: {}]   ;;  %s614_s4 = inlined_call_operand.vmem [shape: f32[1,32], index: 4, kind: input, shape index: {}]   ;;  %s615_s5 = inlined_call_operand.hbm [shape: f32[32,32], index: 5, kind: input, shape index: {}]   ;;  %s616_s6 = inlined_call_operand.vmem [shape: f32[1,32], index: 6, kind: input, shape index: {}]   ;;  %s617_s7 = inlined_call_operand.hbm [shape: f32[8,32], index: 7, kind: output, shape index: {}]  }
   0x1   :  { %13 = vsyncpa [#allocation6], 0 }
   0x2   :  { %14 = vsyncpa [#allocation9], 0 }
   0x3   :  { %15 = vsyncpa [#allocation4], 0  ;;  %s525_s24 = smov [#allocation5]  }
   0x4   :  { %s31_s25 = sshll.u32 %s525_s24, 4  ;;  %s32_s25 = int_to_ptr.vmem [resolvable:$true] %s31_s25 }
   0x5   :  { %s425_s26 = scalar_lea.vmem %s32_s25, 256  ;;  %p430_p1 = scmp.lt.s32.totalorder %s32_s25, %s32_s25 }
   0x6   :  { %p426_p0 = scmp.ne.s32.totalorder %s32_s25, %s425_s26  ;;  %p431_p2 = scmp.lt.s32.totalorder %s425_s26, %s425_s26 }
   0x8   :  { %p432_p3 = por %p431_p2, %p430_p1 }
   0xa   :  { %p433_p4 = pnand %p432_p3, %p426_p0 }
   0xc   :  { %436 = shalt.err (!%p433_p4)
}
   0xd   :  { %s526_s27 = smov 128   ;;  %s527_s28 = smov 8  }
   0xe   :  { %37 = dma.hbm_to_vmem [thread:$0]  %s611_s1, 256, %s32_s25, [#allocation6], %s526_s27, %s526_s27, %s527_s28  }
   0xf   :  { %s528_s8 = smov [#allocation2]   ;;  %s529_s10 = smov [#allocation7]  }
  0x10   :  { %s22_s9 = sshll.u32 %s528_s8, 4  ;;  %s45_s11 = sshll.u32 %s529_s10, 4  ;;  %s23_s9 = int_to_ptr.vmem [resolvable:$true] %s22_s9  ;;  %s46_s11 = int_to_ptr.vmem [resolvable:$true] %s45_s11 }
  0x11   :  { %s445_s12 = scalar_lea.vmem %s23_s9, 128  ;;  %p450_p6 = scmp.lt.s32.totalorder %s23_s9, %s23_s9 }
  0x12   :  { %p446_p5 = scmp.ne.s32.totalorder %s23_s9, %s445_s12  ;;  %p451_p7 = scmp.lt.s32.totalorder %s445_s12, %s445_s12 }
  0x14   :  { %p452_p8 = por %p451_p7, %p450_p6 }
  0x16   :  { %p453_p9 = pnand %p452_p8, %p446_p5 }
  0x18   :  { %456 = shalt.err (!%p453_p9)
}
  0x19   :  { %25 = dma.hbm_to_vmem [thread:$0]  %s610_s0, 128, %s23_s9, [#allocation3]  }
  0x1a   :  { %s465_s15 = scalar_lea.vmem %s46_s11, 512  ;;  %p470_p11 = scmp.lt.s32.totalorder %s46_s11, %s46_s11 }
  0x1b   :  { %p466_p10 = scmp.ne.s32.totalorder %s46_s11, %s465_s15  ;;  %p471_p12 = scmp.lt.s32.totalorder %s465_s15, %s465_s15 }
  0x1d   :  { %p472_p13 = por %p471_p12, %p470_p11 }
  0x1f   :  { %p473_p0 = pnand %p472_p13, %p466_p10 }
  0x21   :  { %476 = shalt.err (!%p473_p0)
}
  0x22   :  { %51 = dma.hbm_to_vmem [thread:$0]  %s613_s3, 512, %s46_s11, [#allocation6], %s526_s27, %s526_s27, %s527_s28  }
  0x23   :  { %s530_s17 = smov [#allocation8]  }
  0x24   :  { %s59_s18 = sshll.u32 %s530_s17, 4  ;;  %s60_s18 = int_to_ptr.vmem [resolvable:$true] %s59_s18 }
  0x25   :  { %s485_s19 = scalar_lea.vmem %s60_s18, 512  ;;  %p490_p2 = scmp.lt.s32.totalorder %s60_s18, %s60_s18 }
  0x26   :  { %p486_p1 = scmp.ne.s32.totalorder %s60_s18, %s485_s19  ;;  %p491_p3 = scmp.lt.s32.totalorder %s485_s19, %s485_s19 }
  0x28   :  { %p492_p4 = por %p491_p3, %p490_p2 }
  0x2a   :  { %p493_p5 = pnand %p492_p4, %p486_p1 }
  0x2c   :  { %496 = shalt.err (!%p493_p5)
}
  0x2d   :  { %65 = dma.hbm_to_vmem [thread:$0]  %s615_s5, 512, %s60_s18, [#allocation9], %s526_s27, %s526_s27, %s527_s28  }
  0x2e   :  { %517 = dma.done.wait [#allocation3], 128  }
  0x2f   :  { %518 = vsyncadd [#allocation3], 4294967168 }
  0x30   :  { %519 = dma.done.wait [#allocation6], 768  }
  0x31   :  { %520 = vsyncadd [#allocation6], 4294966528 }
  0x32   :  { %521 = dma.done.wait [#allocation9], 512  }
  0x33   :  { %522 = vsyncadd [#allocation9], 4294966784  ;;  %v531_v0 = vmov 0.0   ;;  %vm532_vm0 = vmmov 0   ;;  %v82_v1 = vld [vmem:[#allocation5 + $0x8] sm:$0xff]  ;;  %v81_v2 = vld [vmem:[#allocation5] sm:$0xff] }
  0x34   :  { %373 = vmatprep.subr.mxu0 %v531_v0  ;;  %377 = vmatprep.mubr.msk.f32.mxu0 %vm532_vm0, %v531_v0  ;;  %v80_v3 = vld [vmem:[#allocation2] sm:$0xff]  ;;  %vm90_vm1 = vcmask 130048   ;;  %v168_v4 = vld [vmem:[#allocation7 + $0x18] sm:$0xff]  ;;  %v167_v5 = vld [vmem:[#allocation7 + $0x10] sm:$0xff]  ;;  %vm176_vm2 = vcmask 261120   ;;  %s533_s24 = smov [#allocation10]  }
  0x35   :  { %380 = vmatprep.subr.mxu1 %v531_v0  ;;  %388 = vmatprep.mubr.msk.f32.mxu1 %vm532_vm0, %v531_v0  ;;  %v166_v6 = vld [vmem:[#allocation7 + $0x8] sm:$0xff]  ;;  %v165_v7 = vld [vmem:[#allocation7] sm:$0xff]  ;;  %v254_v13 = vld [vmem:[#allocation8 + $0x18] sm:$0xff]  ;;  %s343_s25 = sshll.u32 %s533_s24, 4  ;;  %s344_s25 = int_to_ptr.vmem [resolvable:$true] %s343_s25 }
  0x36   :  { %374 = vmatpush3.msra.mxu0 %v82_v1  ;;  %381 = vmatpush3.msra.mxu1 %v168_v4  ;;  %v354_v8 = vld [vmem:[%s612_s2] ss:$0 sm:$0xff]  ;;  %v253_v14 = vld [vmem:[#allocation8 + $0x10] sm:$0xff]  ;;  %v251_v16 = vld [vmem:[#allocation8] sm:$0xff]  ;;  %p502_p7 = scmp.lt.s32.totalorder %s344_s25, %s344_s25 }
  0x37   :  { %375 = vmatprep.subr.mxu0 %v531_v0  ;;  %382 = vmatprep.subr.mxu1 %v531_v0  ;;  %v252_v15 = vld [vmem:[#allocation8 + $0x8] sm:$0xff] }
  0x38   :  { %376 = vmatpush3.msra.mxu0 %v81_v2  ;;  %383 = vmatpush3.msra.mxu1 %v167_v5  ;;  %v356_v17 = vld [vmem:[%s614_s4] ss:$0 sm:$0xff]  ;;  %s497_s4 = scalar_lea.vmem %s344_s25, 128 }
  0x39   :  { %378 = vmatmul.mubr.msk.f32.vlgmr.msra.gmra.mxu0 %vm90_vm1, %v80_v3  ;;  %391 = vmatprep.subr.mxu0 %v531_v0  ;;  %v358_v22 = vld [vmem:[%s616_s6] ss:$0 sm:$0xff]  ;;  %p498_p6 = scmp.ne.s32.totalorder %s344_s25, %s497_s4  ;;  %p503_p8 = scmp.lt.s32.totalorder %s497_s4, %s497_s4 }
  0x3a   :  { %399 = vmatprep.mubr.msk.f32.mxu0 %vm532_vm0, %v531_v0  ;;  %384 = vmatprep.subr.mxu1 %v531_v0 }
  0x3b   :  { %385 = vmatpush3.msra.mxu1 %v166_v6  ;;  %392 = vmatpush3.msra.mxu0 %v254_v13  ;;  %p504_p9 = por %p503_p8, %p502_p7 }
  0x3c   :  { %386 = vmatprep.subr.mxu1 %v531_v0  ;;  %393 = vmatprep.subr.mxu0 %v531_v0 }
  0x3d   :  { %387 = vmatpush3.msra.mxu1 %v165_v7  ;;  %394 = vmatpush3.msra.mxu0 %v253_v14  ;;  %p505_p10 = pnand %p504_p9, %p498_p6 }
  0x3e   :  { %395 = vmatprep.subr.mxu0 %v531_v0 }
  0x3f   :  { %396 = vmatpush3.msra.mxu0 %v252_v15 }
  0x40   :  { %397 = vmatprep.subr.mxu0 %v531_v0 }
  0x41   :  { %398 = vmatpush3.msra.mxu0 %v251_v16 }
  0xf9   :  { %v160_v9 = vpop.f32.mrf.mxu0 }
  0xfa   :  { %v161_v10 = vadd.f32 %v354_v8, %v160_v9 }
  0xfb   :  { %v379_v11 = vpop.f32.mrf.mxu0 }
  0xfc   :  { %411 = vtanh.f32 %v161_v10 }
 0x109   :  { %v412_v12 = vpop.eup %411 }
 0x10a   :  { %389 = vmatmul.mubr.msk.f32.vlgmr.msra.gmra.mxu1 %vm176_vm2, %v412_v12 }
 0x1ca   :  { %v246_v18 = vpop.f32.mrf.mxu1 }
 0x1cb   :  { %v247_v19 = vadd.f32 %v356_v17, %v246_v18 }
 0x1cc   :  { %v390_v20 = vpop.f32.mrf.mxu1 }
 0x1cd   :  { %413 = vtanh.f32 %v247_v19 }
 0x1da   :  { %v414_v21 = vpop.eup %413 }
 0x1db   :  { %400 = vmatmul.mubr.msk.f32.vlgmr.msra.gmra.mxu0 %vm176_vm2, %v414_v21 }
 0x29b   :  { %v331_v23 = vpop.f32.mrf.mxu0 }
 0x29c   :  { %v332_v24 = vadd.f32 %v358_v22, %v331_v23 }
 0x29d   :  { %v401_v25 = vpop.f32.mrf.mxu0 }
 0x29e   :  { %415 = vtanh.f32 %v332_v24 }
 0x2ab   :  { %v416_v26 = vpop.eup %415 }
 0x2ac   :  { %336 = vst.msk [vmem:[#allocation10] sm:$0xff] %vm176_vm2, %v416_v26 }
 0x2ad   :  { %508 = shalt.err (!%p505_p10)
}
 0x2ae   :  { %346 = dma.vmem_to_hbm [thread:$0]  %s344_s25, 128, %s617_s7, [#allocation4]  }
 0x2af   :  { %523 = dma.done.wait [#allocation4], 128  }
 0x2b0   :  { %524 = vsyncadd [#allocation4], 4294967168 }
 0x2b1   :  { %350 = vsyncpa [#allocation3], 1 }
 0x2b2   :  { %351 = vsyncpa [#allocation6], 1 }
 0x2b3   :  { %352 = vsyncpa [#allocation9], 1 }
 0x2b4   :  { %353 = vsyncpa [#allocation4], 1 }

</bundles_post_ra>
